<compile_context>
chip_gen: v7x
topology: tpu7x:2x2x1
jax: 0.10.0
libtpu: 0.0.40
codegen_flags: <defaults>
</compile_context>

<pallas_src>
import numpy as np
import jax
import jax.numpy as jnp
from jax import lax
from jax.experimental import pallas as pl
from jax.experimental.pallas import tpu as pltpu

EPS = float(np.finfo(np.float32).tiny)      # SafeLog epsilon
NEG_LOG_EPS = float(-np.log(EPS))           # ~87.33655 = SafeLog floor on -log(.)
ALPHA = 0.5
GAMMA = 0.0
WEIGHT = 1.0
IGNORE_LABEL = -1


def _focal_ce_kernel(pred_ref, label_ref, out_ref):
    """One grid step = one (batch b, HW-tile j) block.

    pred_ref : (1, C, T_HW)    f32 logits  (HW on lanes, C on sublanes)
    label_ref: (1, 1, T_HW)    i32 labels
    out_ref  : (1, 1, C, LANE) f32 lane-folded partial loss sums (independent per block)
    """
    x = pred_ref[0]            # (C, T)
    lab = label_ref[0]         # (1, T)
    c, t = x.shape
    lane = out_ref.shape[-1]

    # Channel id per sublane row: row r <-> class r+1 (class 0 = background, no onehot column).
    ch = lax.broadcasted_iota(jnp.int32, (c, t), 0) + 1
    is_pos = lab == ch                        # one-hot compare (label==-1 never matches)
    valid = lab != IGNORE_LABEL               # (1, T), broadcasts over C

    if GAMMA == 0.0:
        # Stable log-sigmoid from a single softplus:
        #   -log(sigmoid(x))     = softplus(-x) = softplus(x) - x
        #   -log(1 - sigmoid(x)) = softplus(x)
        # clamped at -log(eps) to exactly match SafeLog(=log(max(eps, .))) semantics.
        sp = jnp.maximum(x, 0.0) + jnp.log1p(jnp.exp(-jnp.abs(x)))   # softplus(x)
        neg_log_p = jnp.minimum(NEG_LOG_EPS, sp - x)
        neg_log_1mp = jnp.minimum(NEG_LOG_EPS, sp)
    else:
        # General focal path (not traced with the module defaults GAMMA=0).
        p = jax.nn.sigmoid(x)
        log_p = jnp.log(jnp.maximum(EPS, p))
        log_1mp = jnp.log(jnp.maximum(EPS, 1.0 - p))
        if float(GAMMA).is_integer():
            g = int(GAMMA)
            mod_pos = lax.integer_pow(1.0 - p, g)
            mod_neg = lax.integer_pow(p, g)
        else:
            mod_pos = jnp.power(1.0 - p, GAMMA)
            mod_neg = jnp.power(p, GAMMA)
        neg_log_p = -(mod_pos * log_p)
        neg_log_1mp = -(mod_neg * log_1mp)

    elem = jnp.where(is_pos, ALPHA * neg_log_p, (1.0 - ALPHA) * neg_log_1mp)
    elem = jnp.where(valid, elem, 0.0)        # drop ignore_label rows

    # Fold lanes down to <=128 with tile-aligned slices (pure VPU adds); keeps the per-block
    # output tiny and avoids any in-kernel cross-lane reduction / serializing scalar dep.
    partial = elem[:, 0:lane]
    for k in range(1, t // lane):
        partial = partial + elem[:, k * lane:(k + 1) * lane]

    out_ref[0, 0] = partial


def _choose_hw_tile(hw, c, target_bytes=2 << 20):
    """Largest divisor of hw whose (c, tile) f32 block stays <= ~target_bytes,
    preferring multiples of 128 (lane-dense DMA / stores)."""
    max_t = max(1, target_bytes // (4 * c))
    if hw <= max_t:
        return hw
    best, best128 = 1, None
    for t in range(1, max_t + 1):
        if hw % t == 0:
            best = t
            if t % 128 == 0:
                best128 = t
    return best128 if best128 is not None else best


@jax.jit
def sigmoid_cross_entropy_retina(pred, label):
    """pred: (B, HW, C) float32 logits; label: (B, HW, 1) or (B, HW) int32. Returns scalar loss."""
    pred = pred.astype(jnp.float32)
    B, HW, C = pred.shape
    label2 = (label[..., 0] if label.ndim == 3 else label).astype(jnp.int32)   # (B, HW)

    # Layout plumbing: large HW axis -> lanes, small C axis -> sublanes; label lane-dense.
    pred_t = jnp.transpose(pred, (0, 2, 1))       # (B, C, HW)
    label3 = label2.reshape(B, 1, HW)             # (B, 1, HW)

    t_hw = _choose_hw_tile(HW, C)
    n_hw = HW // t_hw
    lane = 128 if t_hw % 128 == 0 else t_hw

    partials = pl.pallas_call(
        _focal_ce_kernel,
        out_shape=jax.ShapeDtypeStruct((B, n_hw, C, lane), jnp.float32),
        grid_spec=pltpu.PrefetchScalarGridSpec(
            num_scalar_prefetch=0,
            grid=(B, n_hw),
            in_specs=[
                pl.BlockSpec((1, C, t_hw), lambda b, j: (b, 0, j)),
                pl.BlockSpec((1, 1, t_hw), lambda b, j: (b, 0, j)),
            ],
            out_specs=pl.BlockSpec((1, 1, C, lane), lambda b, j: (b, j, 0, 0)),
        ),
        compiler_params=pltpu.CompilerParams(
            # Every block writes an independent partial -> both axes shard across
            # TensorCores (2x on v7x megacore, neutral on single-TC v5e/v6e).
            dimension_semantics=("parallel", "parallel"),
        ),
    )(pred_t, label3)

    # Tiny final reduction + normalization in plain JAX.
    loss_sum = jnp.sum(partials)
    positive = jnp.sum((label2 > 0).astype(jnp.float32))
    return loss_sum / jnp.maximum(positive, 1.0) * WEIGHT


def _reference(pred, label):
    """Plain-JAX replica of the PyTorch forward (sanity check)."""
    B, HW, C = pred.shape
    mask = (label != IGNORE_LABEL).astype(jnp.float32)                 # (B,HW,1)
    vlabel = (label * (label != IGNORE_LABEL)).astype(jnp.int32)       # (B,HW,1)
    onehot = jax.nn.one_hot(vlabel[..., 0], C + 1)[..., 1:]            # (B,HW,C)
    p = jax.nn.sigmoid(pred)
    log_p = jnp.log(jnp.maximum(EPS, p))
    log_1mp = jnp.log(jnp.maximum(EPS, 1.0 - p))
    pos_part = (1.0 - p) ** GAMMA * onehot * log_p
    neg_part = p ** GAMMA * (1.0 - onehot) * log_1mp
    loss = -(ALPHA * pos_part + (1.0 - ALPHA) * neg_part).sum(axis=2) * mask[..., 0]
    positive = (label > 0).astype(jnp.float32).sum()
    return loss.sum() / jnp.maximum(positive, 1.0) * WEIGHT


if __name__ == "__main__":
    # Small shapes consistent with the module: B=2, HW=64 (e.g. 8x8 score map), C=8 classes.
    B, HW, C = 2, 64, 8
    key = jax.random.PRNGKey(0)
    k_pred, k_label = jax.random.split(key)

    pred = jax.random.normal(k_pred, (B, HW, C), dtype=jnp.float32)
    # labels in {-1, 0, 1, ..., C}: ignore, background, or one of C foreground classes
    label = jax.random.randint(k_label, (B, HW, 1), minval=-1, maxval=C + 1, dtype=jnp.int32)

    loss = jax.block_until_ready(sigmoid_cross_entropy_retina(pred, label))
    ref = jax.block_until_ready(_reference(pred, label))
    assert np.allclose(np.asarray(loss), np.asarray(ref), rtol=1e-5, atol=1e-5), (loss, ref)

    print("KERNEL_OK")
</pallas_src>

<mosaic_0001>
module attributes {stable_mosaic.version = 11 : i64} {
  func.func @_focal_ce_kernel(%arg0: i32, %arg1: i32, %arg2: memref<1x8x64xf32, #tpu.memory_space<vmem>>, %arg3: memref<1x1x64xi32, #tpu.memory_space<vmem>>, %arg4: memref<1x1x8x64xf32, #tpu.memory_space<vmem>>) attributes {dimension_semantics = [#tpu.dimension_semantics<parallel>, #tpu.dimension_semantics<parallel>], iteration_bounds = array<i64: 2, 1>, scalar_prefetch = 0 : i64, scratch_operands = 0 : i64, tpu.core_type = #tpu.core_type<tc>, window_params = [{transform_indices = @transform_0, window_bounds = array<i64: 1, 8, 64>}, {transform_indices = @transform_1, window_bounds = array<i64: 1, 1, 64>}, {transform_indices = @transform_2, window_bounds = array<i64: 1, 1, 8, 64>}]} {
    %c0 = arith.constant 0 : index
    %c0_0 = arith.constant 0 : index
    %c0_1 = arith.constant 0 : index
    %0 = vector.load %arg2[%c0, %c0_0, %c0_1] : memref<1x8x64xf32, #tpu.memory_space<vmem>>, vector<1x8x64xf32>
    %1 = vector.shape_cast %0 : vector<1x8x64xf32> to vector<8x64xf32>
    %c0_2 = arith.constant 0 : index
    %c0_3 = arith.constant 0 : index
    %c0_4 = arith.constant 0 : index
    %2 = vector.load %arg3[%c0_2, %c0_3, %c0_4] : memref<1x1x64xi32, #tpu.memory_space<vmem>>, vector<1x1x64xi32>
    %3 = vector.shape_cast %2 : vector<1x1x64xi32> to vector<1x64xi32>
    %4 = tpu.iota {dimensions = array<i32: 0>} : vector<8x64xi32>
    %c1_i32 = arith.constant 1 : i32
    %5 = vector.broadcast %c1_i32 : i32 to vector<8x64xi32>
    %6 = arith.addi %4, %5 : vector<8x64xi32>
    %7 = vector.broadcast %3 : vector<1x64xi32> to vector<8x64xi32>
    %8 = arith.cmpi eq, %7, %6 : vector<8x64xi32>
    %c-1_i32 = arith.constant -1 : i32
    %9 = vector.broadcast %c-1_i32 : i32 to vector<1x64xi32>
    %10 = arith.cmpi ne, %3, %9 : vector<1x64xi32>
    %cst = arith.constant 0.000000e+00 : f32
    %11 = vector.broadcast %cst : f32 to vector<8x64xf32>
    %12 = arith.maximumf %1, %11 : vector<8x64xf32>
    %13 = math.absf %1 : vector<8x64xf32>
    %cst_5 = arith.constant 0.000000e+00 : f32
    %14 = vector.broadcast %cst_5 : f32 to vector<8x64xf32>
    %15 = arith.subf %14, %13 : vector<8x64xf32>
    %16 = math.exp %15 : vector<8x64xf32>
    %17 = math.log1p %16 : vector<8x64xf32>
    %18 = arith.addf %12, %17 : vector<8x64xf32>
    %19 = arith.subf %18, %1 : vector<8x64xf32>
    %cst_6 = arith.constant 87.3365478 : f32
    %20 = vector.broadcast %cst_6 : f32 to vector<8x64xf32>
    %21 = arith.minimumf %20, %19 : vector<8x64xf32>
    %cst_7 = arith.constant 87.3365478 : f32
    %22 = vector.broadcast %cst_7 : f32 to vector<8x64xf32>
    %23 = arith.minimumf %22, %18 : vector<8x64xf32>
    %cst_8 = arith.constant 5.000000e-01 : f32
    %24 = vector.broadcast %cst_8 : f32 to vector<8x64xf32>
    %25 = arith.mulf %24, %21 : vector<8x64xf32>
    %cst_9 = arith.constant 5.000000e-01 : f32
    %26 = vector.broadcast %cst_9 : f32 to vector<8x64xf32>
    %27 = arith.mulf %26, %23 : vector<8x64xf32>
    %28 = arith.select %8, %25, %27 : vector<8x64xi1>, vector<8x64xf32>
    %cst_10 = arith.constant 0.000000e+00 : f32
    %29 = vector.shape_cast %10 : vector<1x64xi1> to vector<1x64xi1>
    %30 = vector.broadcast %29 : vector<1x64xi1> to vector<8x64xi1>
    %31 = vector.broadcast %cst_10 : f32 to vector<8x64xf32>
    %32 = arith.select %30, %28, %31 : vector<8x64xi1>, vector<8x64xf32>
    %c0_11 = arith.constant 0 : index
    %c0_12 = arith.constant 0 : index
    %c0_13 = arith.constant 0 : index
    %c0_14 = arith.constant 0 : index
    %33 = vector.load %arg4[%c0_11, %c0_12, %c0_13, %c0_14] : memref<1x1x8x64xf32, #tpu.memory_space<vmem>>, vector<1x1x8x64xf32>
    %34 = vector.shape_cast %33 : vector<1x1x8x64xf32> to vector<8x64xf32>
    %35 = vector.shape_cast %32 : vector<8x64xf32> to vector<1x1x8x64xf32>
    tpu.vector_store %arg4[%c0_11, %c0_12, %c0_13, %c0_14], %35 {strides = array<i32>} : memref<1x1x8x64xf32, #tpu.memory_space<vmem>>, vector<1x1x8x64xf32>,
    return
  }
  func.func @transform_0(%arg0: i32, %arg1: i32) -> (i32, i32, i32) {
    %c0_i32 = arith.constant 0 : i32
    %c0_i32_0 = arith.constant 0 : i32
    return %arg0, %c0_i32, %arg1 : i32, i32, i32
  }
  func.func @transform_1(%arg0: i32, %arg1: i32) -> (i32, i32, i32) {
    %c0_i32 = arith.constant 0 : i32
    %c0_i32_0 = arith.constant 0 : i32
    return %arg0, %c0_i32, %arg1 : i32, i32, i32
  }
  func.func @transform_2(%arg0: i32, %arg1: i32) -> (i32, i32, i32, i32) {
    %c0_i32 = arith.constant 0 : i32
    %c0_i32_0 = arith.constant 0 : i32
    %c0_i32_1 = arith.constant 0 : i32
    return %arg0, %arg1, %c0_i32, %c0_i32_0 : i32, i32, i32, i32
  }
}

</mosaic_0001>

<bundles_post_ra>
// kernel: sigmoid_cross_entropy_retina.1
= control target key start
LH: loop header
LB: loop body
LE: loop exit
PB: predicated region body
PF: predicated region fallthrough
CT: control target
= control target key end

     0   :  { %7 = vsyncpa [#allocation3], 0  ;;  %s646_s0 = inlined_call_operand.hbm [shape: f32[2,8,64], index: 0, kind: input, shape index: {}]   ;;  %s647_s1 = inlined_call_operand.vmem [shape: s32[2,1,64], index: 1, kind: input, shape index: {}]   ;;  %s648_s2 = inlined_call_operand.vmem [shape: f32[2,1,8,64], index: 2, kind: output, shape index: {}]  }
   0x1   :  { %9 = vsyncpa [#allocation3 + $0x1], 0  ;;  %s514_s9 = smov 0   ;;  %s516_s10 = smov 0  }
   0x2   :  { %s518_s11 = smov 0   ;;  %s520_s12 = smov 0  }
   0x3   :  { %s522_s13 = smov 0   ;;  %s524_s14 = smov 0  }
   0x4 LB: > { %s344_s15 = sadd.s32 4294967295, %s495_s14   ;;  %s27_s16 = sadd.s32 1, %s491_s13  ;;  %s495_s14 = sphi %s524_s14, %s15_s14   ;;  %s491_s13 = sphi %s522_s13, %s658_s13   ;;  %s487_s12 = sphi %s520_s12, %s657_s12   ;;  %s483_s11 = sphi %s518_s11, %s656_s11   ;;  %s479_s10 = sphi %s516_s10, %s655_s10   ;;  %s475_s9 = sphi %s514_s9, %s654_s9  }
   0x5   : > { %p29_p0 = scmp.ge.s32.totalorder %s27_s16, 2  ;;  %s36_s17 = sadd.s32 1, %s483_s11 }
   0x6   : > { %p43_p1 = scmp.ne.s32.totalorder %s483_s11, %s479_s10  ;;  %p44_p2 = scmp.eq.s32.totalorder %s495_s14, 0 }
   0x7   : > { %s660_s16 = smov (%p29_p0, %s27_s16), 0  ;;  %p49_p4 = scmp.ne.s32.totalorder %s479_s10, %s475_s9 }
   0x8   : > { %p550_p3 = por %p44_p2, %p43_p1  ;;  %s31_s19 = ssub.s32 %s491_s13, %s660_s16 }
   0x9   : > { %p50_p5 = scmp.eq.s32.totalorder %s344_s15, 0  ;;  %p34_p6 = scmp.eq.s32.totalorder %s31_s19, 0 }
   0xa   : > { %p361_p8 = scmp.lt.s32.totalorder %s495_s14, 2  ;;  %s129_s22 = sand.u32 1, %s483_s11  }
   0xb   : > { %p557_p7 = por %p50_p5, %p49_p4  ;;  %s349_s23 = sshll.u32 %s491_s13, 7 }
   0xc   : > { %s563_s21 = scalar_select %p34_p6, %s483_s11, %s36_s17  }
   0xd   : > { %s348_s24 = sshll.u32 %s129_s22, 3  ;;  %s570_s27 = scalar_lea.hbm %s646_s0, %s349_s23 }
   0xe   : > { %s133_s28 = scalar_lea.vmem [#allocation2], %s348_s24  ;;  %p574_p9 = pnand %p361_p8, %p550_p3 }
   0xf   : > { %s141_s29 = sshll.u32 %s133_s28, 4  ;;  %s130_s3 = scalar_lea.sflag [#allocation3], %s129_s22  ;;  %s578_s29 = int_to_ptr.vmem [resolvable:$true] %s141_s29 }
  0x10   : > { %s415_s4 = scalar_lea.hbm %s570_s27, 128  ;;  %p417_p13 = pneg %p574_p9 }
  0x11   : > { %p416_p12 = scmp.ne.s32.totalorder %s570_s27, %s415_s4  ;;  %s420_s7 = scalar_lea.hbm %s646_s0, 256 }
  0x12   : > { %p421_p2 = scmp.lt.u32.totalorder %s570_s27, %s646_s0  ;;  %p422_p3 = scmp.lt.u32.totalorder %s420_s7, %s415_s4 }
  0x13   : > { %p418_p0 = pnand %p417_p13, %p416_p12  ;;  %p424_p5 = scmp.lt.u32.totalorder %s415_s4, %s570_s27 }
  0x14   : > { %p423_p4 = por %p422_p3, %p421_p2 }
  0x15   : > { %p419_p1 = pneg %p418_p0 }
  0x16   : > { %p425_p6 = por %p424_p5, %p423_p4 }
  0x18   : > { %p426_p8 = pnand %p425_p6, %p419_p1 }
  0x1a   : > { %429 = shalt.err (!%p426_p8)
}
  0x1b   : > { %s430_s15 = scalar_lea.vmem %s578_s29, 128  ;;  %s497_s17 = smov [#allocation2]  }
  0x1c   : > { %p431_p12 = scmp.ne.s32.totalorder %s578_s29, %s430_s15  ;;  %s435_s18 = sshll.u32 %s497_s17, 4  ;;  %s436_s18 = int_to_ptr.vmem [resolvable:$false] %s435_s18 }
  0x1d   : > { %s437_s19 = scalar_lea.vmem %s436_s18, 256  ;;  %p438_p11 = scmp.lt.s32.totalorder %s578_s29, %s436_s18 }
  0x1e   : > { %p433_p0 = pnand %p431_p12, %p417_p13  ;;  %p439_p2 = scmp.lt.s32.totalorder %s437_s19, %s430_s15 }
  0x20   : > { %p434_p10 = pneg %p433_p0  ;;  %p440_p3 = por %p439_p2, %p438_p11 }
  0x22   : > { %p441_p4 = pnand %p440_p3, %p434_p10 }
  0x24   : > { %444 = shalt.err (!%p441_p4)
}
  0x25   : > { %360 = dma.hbm_to_vmem [thread:$0]  (!%p574_p9), %s570_s27, 128, %s578_s29, %s130_s3  }
  0x26   : > { %p652_p1 = scmp.lt.s32.totalorder %s495_s14, 3  ;;  %p653_p5 = scmp.ge.s32.totalorder %s495_s14, 1 }
  0x28   : > { %p156_p13 = pnand %p653_p5, %p652_p1 }
  0x29   : > { %s161_s22 = sand.u32 (!%p156_p13), 1, %s479_s10  }
  0x2a   : > { %159 = sbr.rel (%p156_p13) target bundleno = 95 (0x5f), region = 28  ;;  %s351_s23 = sshll.u32 (!%p156_p13), %s161_s22, 3 }
  0x2b   : > { %s162_s24 = scalar_lea.sflag (!%p156_p13), [#allocation3], %s161_s22  ;;  %s165_s25 = scalar_lea.vmem (!%p156_p13), [#allocation2], %s351_s23 }
  0x31   : > { %470 = dma.done.wait (%p557_p7), %s162_s24, 128  }
  0x32   : > { %472 = vsyncadd (%p557_p7), %s162_s24, 4294967168  ;;  %v207_v0 = vld [vmem:[%s165_s25] sm:$0xff]  ;;  %p194_p9 = scmp.lt.s32.totalorder %s487_s12, 1  ;;  %v209_v7 = vlaneseq  ;;  %v498_v18 = vmov 0   ;;  %vm246_vm4 = vcmask 523264  }
  0x33   : > { %v219_v1 = vand.u32 2147483647, %v207_v0  ;;  %v218_v14 = vmax.f32 %v207_v0, 0.0 }
  0x34   : > { %s662_s12 = smov (!%p194_p9, %s487_s12), 1  ;;  %v210_v11 = vshrl.u32 %v209_v7, 7 }
  0x35   : > { %v220_v2 = vsub.f32 0.0, %v219_v1  ;;  %s199_s20 = scalar_lea.vmem %s647_s1, %s662_s12  ;;  %s352_s28 = sshll.u32 %s662_s12, 3 }
  0x36   : > { %v208_v10 = vld [vmem:[%s199_s20] sm:$0x1]  ;;  %v214_v15 = vsub.s32 0, %v210_v11  ;;  %v211_v21 = vadd.s32 1, %v210_v11  ;;  %s206_s3 = scalar_lea.vmem %s648_s2, %s352_s28 }
  0x37   : > { %v221_v3 = vmul.f32 1.442695, %v220_v2  ;;  %vm217_vm0 = vcmp.ne.s32.totalorder %v208_v10, 4294967295 }
  0x38   : > { %v239_v19 = vsel %vm217_vm0, 1, %v498_v18  ;;  %v215_v22 = vrot.slane %v208_v10, %v214_v15 }
  0x39   : > { %411 = vpow2.f32 %v221_v3  ;;  %v243_v25 = vrot.slane %v239_v19, %v214_v15 }
  0x3a   : > { %vm216_vm2 = vcmp.eq.s32.totalorder %v215_v22, %v211_v21 }
  0x3b   : > { %vm244_vm3 = vcmp.eq.s32.totalorder %v243_v25, 1 }
  0x43   : > { %v412_v4 = vpop.eup %411 }
  0x44   : > { %v223_v5 = vadd.f32 1.0, %v412_v4  ;;  %v226_v6 = vmul.f32 -0.5, %v412_v4  ;;  %v229_v9 = vand.u32 2147483647, %v412_v4 }
  0x46   : > { %413 = vlog2.f32 %v223_v5  ;;  %v227_v8 = vadd.f32 1.0, %v226_v6  ;;  %vm230_vm1 = vcmp.lt.f32.partialorder %v229_v9, 0.0004427343 }
  0x48   : > { %v228_v12 = vmul.f32 %v412_v4, %v227_v8 }
  0x50   : > { %v414_v13 = vpop.eup %413 }
  0x51   : > { %v225_v16 = vmul.f32 0.6931472, %v414_v13 }
  0x53   : > { %v231_v17 = vsel %vm230_vm1, %v228_v12, %v225_v16 }
  0x54   : > { %v232_v20 = vadd.f32 %v231_v17, %v218_v14 }
  0x56   : > { %v233_v23 = vsub.f32 %v232_v20, %v207_v0  ;;  %v235_v24 = vmin.f32 %v232_v20, 87.33655 }
  0x58   : > { %v234_v26 = vmin.f32 %v233_v23, 87.33655  ;;  %v237_v27 = vmul.f32 0.5, %v235_v24 }
  0x5a   : > { %v236_v28 = vmul.f32 0.5, %v234_v26 }
  0x5c   : > { %v238_v29 = vsel %vm216_vm2, %v236_v28, %v237_v27 }
  0x5d   : > { %v245_v30 = vsel %vm244_vm3, %v238_v29, 0.0 }
  0x5e   : > { %247 = vst.msk [vmem:[%s206_s3] sm:$0xff] %vm246_vm4, %v245_v30 }
  0x5f PF: > { %s15_s14 = sadd.s32 1, %s495_s14   ;;  %s654_s9 = smov %s479_s10 }
  0x60   : > { %p12_p7 = scmp.ge.s32.totalorder %s15_s14, 4   ;;  %s655_s10 = smov %s483_s11 }
  0x61   : > { %s656_s11 = smov %s563_s21  ;;  %s657_s12 = smov %s491_s13 }
  0x62   : > { %s658_s13 = smov %s660_s16  ;;  %14 = sbr.rel (!%p12_p7) target bundleno = 4 (0x4), region = 71 }
  0x69   :  { %273 = vsyncpa [#allocation3], 1 }
  0x6a   :  { %275 = vsyncpa [#allocation3 + $0x1], 1 }

</bundles_post_ra>
